<compile_context>
chip_gen: v6e
topology: v6e:2x2x1
jax: 0.10.0
libtpu: 0.0.40
codegen_flags: <defaults>
</compile_context>

<pallas_src>
import numpy as np
import jax
import jax.numpy as jnp
from jax.experimental import pallas as pl
from jax.experimental.pallas import tpu as pltpu


# ---------------------------------------------------------------------------
# Bilinear interpolation matrices (PyTorch align_corners=False semantics)
# ---------------------------------------------------------------------------
def _bilinear_matrix(out_size: int, in_size: int) -> np.ndarray:
    """A of shape (out_size, in_size): y_out = A @ y_in (1-D bilinear, a_c=False)."""
    scale = in_size / out_size
    src = (np.arange(out_size, dtype=np.float64) + 0.5) * scale - 0.5
    src = np.maximum(src, 0.0)                       # PyTorch clamps negative src
    i0 = np.minimum(np.floor(src).astype(np.int64), in_size - 1)
    i1 = np.minimum(i0 + 1, in_size - 1)
    lam = src - i0
    A = np.zeros((out_size, in_size), dtype=np.float32)
    A[np.arange(out_size), i0] += (1.0 - lam).astype(np.float32)
    A[np.arange(out_size), i1] += lam.astype(np.float32)
    return A


def _upsample_matrix(h_out, w_out, h_in, w_in) -> np.ndarray:
    """M of shape (h_in*w_in, h_out*w_out): x_up_flat = x_flat @ M."""
    Ah = _bilinear_matrix(h_out, h_in)
    Aw = _bilinear_matrix(w_out, w_in)
    return np.kron(Ah, Aw).T.astype(np.float32)


def _upsample_colsum(h_out, w_out, h_in, w_in) -> np.ndarray:
    """m of shape (h_in*w_in, 1): sum over output pixels of the interp matrix,
    so mean(upsample(x)) == (x_flat @ m) / (h_out*w_out)."""
    return _upsample_matrix(h_out, w_out, h_in, w_in).sum(axis=1, keepdims=True)


# ---------------------------------------------------------------------------
# VMEM-aware batch-tile selection
# ---------------------------------------------------------------------------
def _pick_batch_tile(B, C, HW, HW1, HW2,
                     target_slab_bytes=2 << 20,     # ~2 MB x0 slab per grid step
                     vmem_budget_bytes=24 << 20):   # double-buffered, fits v7x 32 MB scoped
    best = 1
    for bt in range(1, B + 1):
        if B % bt:
            continue
        if B >= 2 and B // bt < 2:
            break                                   # keep grid >= 2 for v7x dual-TC
        rows = bt * C
        resident = 2 * rows * (2 * HW + HW1 + HW2) * 4   # x0+out+x1+x2, double-buffered, f32
        if resident > vmem_budget_bytes:
            break
        best = bt
        if rows * HW * 4 >= target_slab_bytes:
            break
    return best


# ---------------------------------------------------------------------------
# Pallas kernel: one grid step == Bt batch elements, rows = Bt*C
# ---------------------------------------------------------------------------
def _fuse_kernel(x0_ref, x1_ref, x2_ref, m1_ref, m2_ref, w1_ref, w2_ref, out_ref):
    hw = x0_ref.shape[-1]
    inv_hw = 1.0 / hw

    # Pooled x_fuse per (image, channel) row:
    #   mean(x0 + x1_up + x2_up) = (rowsum(x0) + x1.colsum(M1) + x2.colsum(M2)) / HW
    pooled = jnp.sum(x0_ref[...], axis=-1, keepdims=True)                       # (R, 1)
    pooled = pooled + jnp.dot(x1_ref[...], m1_ref[...],
                              preferred_element_type=jnp.float32)               # (R, 1)
    pooled = pooled + jnp.dot(x2_ref[...], m2_ref[...],
                              preferred_element_type=jnp.float32)               # (R, 1)
    y = pooled * inv_hw                                                          # (R, 1)

    # Batched SE excite via block-diagonal kron(I_bt, W) weights (no bias).
    h = jnp.maximum(jnp.dot(w1_ref[...], y, preferred_element_type=jnp.float32),
                    0.0)                                                          # (Bt*C/2, 1)
    z = jnp.dot(w2_ref[...], h, preferred_element_type=jnp.float32)              # (R, 1)
    gate = jax.nn.sigmoid(z)                                                      # (R, 1)

    # out = x0 * gate + x0 == x0 * (1 + gate); re-index x0_ref here so the full
    # (R, HW) block is never held live across the SE computation.
    out_ref[...] = (x0_ref[...] * (1.0 + gate)).astype(out_ref.dtype)


# ---------------------------------------------------------------------------
# Wrapper
# ---------------------------------------------------------------------------
def fuse_forward(x0, x1, x2, fc1_w, fc2_w):
    """x0:(B,C,H,W) x1:(B,C,H1,W1) x2:(B,C,H2,W2); fc1_w:(C//2,C) fc2_w:(C,C//2)."""
    B, C, H, W = x0.shape
    _, _, H1, W1 = x1.shape
    _, _, H2, W2 = x2.shape
    HW, HW1, HW2 = H * W, H1 * W1, H2 * W2

    # Column sums of the interpolation matrices (trace-time, f32, tiny).
    m1 = jnp.asarray(_upsample_colsum(H, W, H1, W1))        # (HW1, 1)
    m2 = jnp.asarray(_upsample_colsum(H, W, H2, W2))        # (HW2, 1)

    # Flatten to 2-D (B*C, spatial) slabs; no concat, no bf16 cast pass.
    x0_2d = x0.reshape(B * C, HW).astype(jnp.float32)
    x1_2d = x1.reshape(B * C, HW1).astype(jnp.float32)
    x2_2d = x2.reshape(B * C, HW2).astype(jnp.float32)

    bt = _pick_batch_tile(B, C, HW, HW1, HW2)
    R = bt * C
    Rh = bt * (C // 2)

    # Block-diagonal SE weights so the excite is one matmul pair per grid step.
    eye_bt = jnp.eye(bt, dtype=jnp.float32)
    w1_blk = jnp.kron(eye_bt, fc1_w.astype(jnp.float32))     # (Rh, R)
    w2_blk = jnp.kron(eye_bt, fc2_w.astype(jnp.float32))     # (R, Rh)

    cost = pl.CostEstimate(
        flops=int(2 * B * C * (HW1 + HW2)        # pooled-up matvecs
                  + 4 * B * C * (C // 2)         # SE fc1 + fc2
                  + 3 * B * C * HW),             # rowsum + final x0*(1+gate)
        transcendentals=int(B * C),
        bytes_accessed=int(4 * (2 * B * C * HW + B * C * (HW1 + HW2)
                                + w1_blk.size + w2_blk.size + HW1 + HW2)),
    )

    out_2d = pl.pallas_call(
        _fuse_kernel,
        out_shape=jax.ShapeDtypeStruct((B * C, HW), jnp.float32),
        grid=(B // bt,),
        in_specs=[
            pl.BlockSpec((R, HW), lambda g: (g, 0)),          # x0 slab (f32)
            pl.BlockSpec((R, HW1), lambda g: (g, 0)),         # x1 slab (f32)
            pl.BlockSpec((R, HW2), lambda g: (g, 0)),         # x2 slab (f32)
            pl.BlockSpec((HW1, 1), lambda g: (0, 0)),         # colsum of interp matrix 1
            pl.BlockSpec((HW2, 1), lambda g: (0, 0)),         # colsum of interp matrix 2
            pl.BlockSpec((Rh, R), lambda g: (0, 0)),          # kron(I_bt, fc1_w)
            pl.BlockSpec((R, Rh), lambda g: (0, 0)),          # kron(I_bt, fc2_w)
        ],
        out_specs=pl.BlockSpec((R, HW), lambda g: (g, 0)),
        compiler_params=pltpu.CompilerParams(
            dimension_semantics=("parallel",),
            vmem_limit_bytes=32 << 20,
        ),
        cost_estimate=cost,
    )(x0_2d, x1_2d, x2_2d, m1, m2, w1_blk, w2_blk)

    return out_2d.reshape(B, C, H, W)


# ---------------------------------------------------------------------------
# Pure-JAX f32 reference using the DENSE upsample (checks both the module
# semantics and that the pooled column-sum shortcut is exactly equivalent).
# ---------------------------------------------------------------------------
def fuse_reference(x0, x1, x2, fc1_w, fc2_w):
    B, C, H, W = x0.shape
    a1 = jnp.asarray(_upsample_matrix(H, W, x1.shape[2], x1.shape[3]))
    a2 = jnp.asarray(_upsample_matrix(H, W, x2.shape[2], x2.shape[3]))
    x1_up = (x1.reshape(B, C, -1) @ a1).reshape(B, C, H, W)
    x2_up = (x2.reshape(B, C, -1) @ a2).reshape(B, C, H, W)
    x_fuse = x0 + x1_up + x2_up
    y = jnp.mean(x_fuse, axis=(2, 3))                        # (B, C)
    h = jax.nn.relu(y @ fc1_w.T)                             # (B, C//2)
    gate = jax.nn.sigmoid(h @ fc2_w.T)[:, :, None, None]     # (B, C, 1, 1)
    return x0 * gate + x0


if __name__ == "__main__":
    key = jax.random.PRNGKey(0)
    k0, k1, k2, kw1, kw2 = jax.random.split(key, 5)

    B, C = 2, 64                       # SENet(64) fixes C = 64
    x0 = jax.random.normal(k0, (B, C, 16, 16), dtype=jnp.float32)
    x1 = jax.random.normal(k1, (B, C, 8, 8), dtype=jnp.float32)
    x2 = jax.random.normal(k2, (B, C, 4, 4), dtype=jnp.float32)

    # Deterministic synthetic SE weights (PyTorch Linear layout: (out, in), no bias)
    fc1_w = jax.random.normal(kw1, (C // 2, C), dtype=jnp.float32) * 0.1
    fc2_w = jax.random.normal(kw2, (C, C // 2), dtype=jnp.float32) * 0.1

    out = jax.block_until_ready(fuse_forward(x0, x1, x2, fc1_w, fc2_w))
    ref = jax.block_until_ready(fuse_reference(x0, x1, x2, fc1_w, fc2_w))

    # Fully f32 path now (no bf16 operands); only summation-order differences remain.
    np.testing.assert_allclose(np.asarray(out), np.asarray(ref), rtol=1e-4, atol=1e-4)

    print("KERNEL_OK")
</pallas_src>

<mosaic_0001>
module attributes {stable_mosaic.version = 11 : i64} {
  func.func @_fuse_kernel(%arg0: i32, %arg1: memref<64x256xf32, #tpu.memory_space<vmem>>, %arg2: memref<64x64xf32, #tpu.memory_space<vmem>>, %arg3: memref<64x16xf32, #tpu.memory_space<vmem>>, %arg4: memref<64x1xf32, #tpu.memory_space<vmem>>, %arg5: memref<16x1xf32, #tpu.memory_space<vmem>>, %arg6: memref<32x64xf32, #tpu.memory_space<vmem>>, %arg7: memref<64x32xf32, #tpu.memory_space<vmem>>, %arg8: memref<64x256xf32, #tpu.memory_space<vmem>>) attributes {dimension_semantics = [#tpu.dimension_semantics<parallel>], iteration_bounds = array<i64: 2>, scalar_prefetch = 0 : i64, scratch_operands = 0 : i64, tpu.core_type = #tpu.core_type<tc>, window_params = [{transform_indices = @transform_0, window_bounds = array<i64: 64, 256>}, {transform_indices = @transform_1, window_bounds = array<i64: 64, 64>}, {transform_indices = @transform_2, window_bounds = array<i64: 64, 16>}, {pipeline_mode = #tpu.pipeline_mode<synchronous>, transform_indices = @transform_3, window_bounds = array<i64: 64, 1>}, {pipeline_mode = #tpu.pipeline_mode<synchronous>, transform_indices = @transform_4, window_bounds = array<i64: 16, 1>}, {pipeline_mode = #tpu.pipeline_mode<synchronous>, transform_indices = @transform_5, window_bounds = array<i64: 32, 64>}, {pipeline_mode = #tpu.pipeline_mode<synchronous>, transform_indices = @transform_6, window_bounds = array<i64: 64, 32>}, {transform_indices = @transform_7, window_bounds = array<i64: 64, 256>}]} {
    %c0 = arith.constant 0 : index
    %c0_0 = arith.constant 0 : index
    %0 = vector.load %arg1[%c0, %c0_0] : memref<64x256xf32, #tpu.memory_space<vmem>>, vector<64x256xf32>
    %cst = arith.constant dense<0.000000e+00> : vector<64xf32>
    %1 = vector.multi_reduction <add>, %0, %cst [1] : vector<64x256xf32> to vector<64xf32>
    %2 = vector.shape_cast %1 : vector<64xf32> to vector<64x1xf32>
    %c0_1 = arith.constant 0 : index
    %c0_2 = arith.constant 0 : index
    %3 = vector.load %arg2[%c0_1, %c0_2] : memref<64x64xf32, #tpu.memory_space<vmem>>, vector<64x64xf32>
    %c0_3 = arith.constant 0 : index
    %c0_4 = arith.constant 0 : index
    %4 = vector.load %arg4[%c0_3, %c0_4] : memref<64x1xf32, #tpu.memory_space<vmem>>, vector<64x1xf32>
    %cst_5 = arith.constant dense<0.000000e+00> : vector<64x1xf32>
    %5 = tpu.matmul %3, %4, %cst_5 {dimension_numbers = #tpu.dot_dimension_numbers<[1], [0], [0], [1], [0, 0, 1, 1], [], []>} : vector<64x64xf32>, vector<64x1xf32>, vector<64x1xf32> -> vector<64x1xf32>
    %6 = arith.addf %2, %5 : vector<64x1xf32>
    %c0_6 = arith.constant 0 : index
    %c0_7 = arith.constant 0 : index
    %7 = vector.load %arg3[%c0_6, %c0_7] : memref<64x16xf32, #tpu.memory_space<vmem>>, vector<64x16xf32>
    %c0_8 = arith.constant 0 : index
    %c0_9 = arith.constant 0 : index
    %8 = vector.load %arg5[%c0_8, %c0_9] : memref<16x1xf32, #tpu.memory_space<vmem>>, vector<16x1xf32>
    %cst_10 = arith.constant dense<0.000000e+00> : vector<64x1xf32>
    %9 = tpu.matmul %7, %8, %cst_10 {dimension_numbers = #tpu.dot_dimension_numbers<[1], [0], [0], [1], [0, 0, 1, 1], [], []>} : vector<64x16xf32>, vector<16x1xf32>, vector<64x1xf32> -> vector<64x1xf32>
    %10 = arith.addf %6, %9 : vector<64x1xf32>
    %cst_11 = arith.constant 3.906250e-03 : f32
    %11 = vector.broadcast %cst_11 : f32 to vector<64x1xf32>
    %12 = arith.mulf %10, %11 : vector<64x1xf32>
    %c0_12 = arith.constant 0 : index
    %c0_13 = arith.constant 0 : index
    %13 = vector.load %arg6[%c0_12, %c0_13] : memref<32x64xf32, #tpu.memory_space<vmem>>, vector<32x64xf32>
    %cst_14 = arith.constant dense<0.000000e+00> : vector<32x1xf32>
    %14 = tpu.matmul %13, %12, %cst_14 {dimension_numbers = #tpu.dot_dimension_numbers<[1], [0], [0], [1], [0, 0, 1, 1], [], []>} : vector<32x64xf32>, vector<64x1xf32>, vector<32x1xf32> -> vector<32x1xf32>
    %cst_15 = arith.constant 0.000000e+00 : f32
    %15 = vector.broadcast %cst_15 : f32 to vector<32x1xf32>
    %16 = arith.maximumf %14, %15 : vector<32x1xf32>
    %c0_16 = arith.constant 0 : index
    %c0_17 = arith.constant 0 : index
    %17 = vector.load %arg7[%c0_16, %c0_17] : memref<64x32xf32, #tpu.memory_space<vmem>>, vector<64x32xf32>
    %cst_18 = arith.constant dense<0.000000e+00> : vector<64x1xf32>
    %18 = tpu.matmul %17, %16, %cst_18 {dimension_numbers = #tpu.dot_dimension_numbers<[1], [0], [0], [1], [0, 0, 1, 1], [], []>} : vector<64x32xf32>, vector<32x1xf32>, vector<64x1xf32> -> vector<64x1xf32>
    %19 = arith.negf %18 : vector<64x1xf32>
    %20 = math.exp %19 : vector<64x1xf32>
    %cst_19 = arith.constant 1.000000e+00 : f32
    %21 = vector.broadcast %cst_19 : f32 to vector<64x1xf32>
    %22 = arith.addf %21, %20 : vector<64x1xf32>
    %23 = arith.divf %21, %22 : vector<64x1xf32>
    %c0_20 = arith.constant 0 : index
    %c0_21 = arith.constant 0 : index
    %24 = vector.load %arg1[%c0_20, %c0_21] : memref<64x256xf32, #tpu.memory_space<vmem>>, vector<64x256xf32>
    %cst_22 = arith.constant 1.000000e+00 : f32
    %25 = vector.broadcast %cst_22 : f32 to vector<64x1xf32>
    %26 = arith.addf %25, %23 : vector<64x1xf32>
    %27 = vector.broadcast %26 : vector<64x1xf32> to vector<64x256xf32>
    %28 = arith.mulf %24, %27 : vector<64x256xf32>
    %c0_23 = arith.constant 0 : index
    %c0_24 = arith.constant 0 : index
    %29 = vector.load %arg8[%c0_23, %c0_24] : memref<64x256xf32, #tpu.memory_space<vmem>>, vector<64x256xf32>
    tpu.vector_store %arg8[%c0_23, %c0_24], %28 {strides = array<i32>} : memref<64x256xf32, #tpu.memory_space<vmem>>, vector<64x256xf32>,
    return
  }
  func.func @transform_0(%arg0: i32) -> (i32, i32) {
    %c0_i32 = arith.constant 0 : i32
    %c0_i32_0 = arith.constant 0 : i32
    return %arg0, %c0_i32 : i32, i32
  }
  func.func @transform_1(%arg0: i32) -> (i32, i32) {
    %c0_i32 = arith.constant 0 : i32
    %c0_i32_0 = arith.constant 0 : i32
    return %arg0, %c0_i32 : i32, i32
  }
  func.func @transform_2(%arg0: i32) -> (i32, i32) {
    %c0_i32 = arith.constant 0 : i32
    %c0_i32_0 = arith.constant 0 : i32
    return %arg0, %c0_i32 : i32, i32
  }
  func.func @transform_3(%arg0: i32) -> (i32, i32) {
    %c0_i32 = arith.constant 0 : i32
    %c0_i32_0 = arith.constant 0 : i32
    %c0_i32_1 = arith.constant 0 : i32
    return %c0_i32, %c0_i32_0 : i32, i32
  }
  func.func @transform_4(%arg0: i32) -> (i32, i32) {
    %c0_i32 = arith.constant 0 : i32
    %c0_i32_0 = arith.constant 0 : i32
    %c0_i32_1 = arith.constant 0 : i32
    return %c0_i32, %c0_i32_0 : i32, i32
  }
  func.func @transform_5(%arg0: i32) -> (i32, i32) {
    %c0_i32 = arith.constant 0 : i32
    %c0_i32_0 = arith.constant 0 : i32
    %c0_i32_1 = arith.constant 0 : i32
    return %c0_i32, %c0_i32_0 : i32, i32
  }
  func.func @transform_6(%arg0: i32) -> (i32, i32) {
    %c0_i32 = arith.constant 0 : i32
    %c0_i32_0 = arith.constant 0 : i32
    %c0_i32_1 = arith.constant 0 : i32
    return %c0_i32, %c0_i32_0 : i32, i32
  }
  func.func @transform_7(%arg0: i32) -> (i32, i32) {
    %c0_i32 = arith.constant 0 : i32
    %c0_i32_0 = arith.constant 0 : i32
    return %arg0, %c0_i32 : i32, i32
  }
}

</mosaic_0001>

<bundles_post_ra>
// kernel: tpu_custom_call.1
= control target key start
LH: loop header
LB: loop body
LE: loop exit
PB: predicated region body
PF: predicated region fallthrough
CT: control target
= control target key end

     0   :  { %12 = vsyncpa [#allocation3], 0  ;;  %s1850_s0 = inlined_call_operand.vmem [shape: f32[128,256], index: 0, kind: input, shape index: {}]   ;;  %s1851_s1 = inlined_call_operand.vmem [shape: f32[128,64], index: 1, kind: input, shape index: {}]   ;;  %s1852_s2 = inlined_call_operand.vmem [shape: f32[128,16], index: 2, kind: input, shape index: {}]   ;;  %s1853_s3 = inlined_call_operand.vmem [shape: f32[64,1], index: 3, kind: input, shape index: {}]   ;;  %s1854_s4 = inlined_call_operand.vmem [shape: f32[16,1], index: 4, kind: input, shape index: {}]   ;;  %s1855_s5 = inlined_call_operand.vmem [shape: f32[32,64], index: 5, kind: input, shape index: {}]   ;;  %s1856_s6 = inlined_call_operand.vmem [shape: f32[64,32], index: 6, kind: input, shape index: {}]   ;;  %s1857_s7 = inlined_call_operand.hbm [shape: f32[128,256], index: 7, kind: output, shape index: {}]  }
   0x1   :  { %14 = vsyncpa [#allocation3 + $0x1], 0  ;;  %s1524_s24 = smov 0   ;;  %s1526_s25 = smov 0  }
   0x2   :  { %s1528_s26 = smov 0   ;;  %s1530_s27 = smov 0  }
   0x3 LB: > { %s1545_s28 = sadd.s32 4294967295, %s1478_s27   ;;  %s1149_s29 = sadd.s32 4294967294, %s1478_s27   ;;  %s1478_s27 = sphi %s1530_s27, %s1863_s27   ;;  %s1474_s26 = sphi %s1528_s26, %s1862_s26   ;;  %s1470_s25 = sphi %s1526_s25, %s1861_s25   ;;  %s1466_s24 = sphi %s1524_s24, %s1860_s24  }
   0x4   : > { %s1549_s30 = sadd.s32 1, %s1478_s27   ;;  %s189_s8 = sadd.s32 1, %s1474_s26 }
   0x5   : > { %s186_s9 = ssub.s32 %s1478_s27, %s1549_s30  ;;  %p199_p0 = scmp.ne.s32.totalorder %s1474_s26, %s1470_s25 }
   0x6   : > { %p187_p1 = scmp.eq.s32.totalorder %s186_s9, 0  ;;  %p200_p2 = scmp.eq.s32.totalorder %s1545_s28, 1 }
   0x7   : > { %p205_p3 = scmp.ne.s32.totalorder %s1470_s25, %s1466_s24  ;;  %p206_p4 = scmp.eq.s32.totalorder %s1149_s29, 1 }
   0x8   : > { %s1560_s10 = scalar_select %p187_p1, %s1474_s26, %s189_s8  }
   0x9   : > { %p1562_p5 = por %p200_p2, %p199_p0  ;;  %p1566_p6 = por %p206_p4, %p205_p3 }
   0xa   : > { %p1152_p7 = scmp.ge.s32.totalorder %s1478_s27, 1  ;;  %p264_p8 = scmp.lt.s32.totalorder %s1478_s27, 3 }
   0xc   : > { %p265_p9 = pnand %p1152_p7, %p264_p8 }
   0xd   : > { %s1154_s17 = sshll.u32 (!%p265_p9), %s1545_s28, 3  ;;  %s1205_s18 = sshll.u32 (!%p265_p9), %s1545_s28, 11 }
   0xe   : > { %268 = sbr.rel (%p265_p9) target bundleno = 861 (0x35d), region = 48  ;;  %p308_p10 = scmp.lt.s32.totalorder (!%p265_p9), %s1154_s17, 15 }
   0xf   : > { %s1800_s21 = scalar_lea.hbm (!%p265_p9), %s1857_s7, %s1205_s18  ;;  %s1481_s23 = smov (!%p265_p9), [#allocation2]  }
  0x13   : > { %v382_v0 = vld [vmem:[%s1853_s3 + $0x38] sm:$0xff]  ;;  %v381_v1 = vld [vmem:[%s1853_s3 + $0x30] sm:$0xff]  ;;  %v380_v2 = vld [vmem:[%s1853_s3 + $0x28] sm:$0xff]  ;;  %s1865_s17 = smov (!%p308_p10, %s1154_s17), 15  ;;  %vm383_vm0 = vcmask 523264   ;;  %vm531_vm1 = vcmask 130048  }
  0x14   : > { %1256 = vmatprep.subr.mxu0 %v382_v0  ;;  %v530_v3 = vld [vmem:[%s1854_s4 + $0x8] sm:$0xff]  ;;  %v529_v4 = vld [vmem:[%s1854_s4] sm:$0xff]  ;;  %s1158_s9 = sshll.u32 %s1865_s17, 3  ;;  %v378_v6 = vld [vmem:[%s1853_s3 + $0x18] sm:$0xff]  ;;  %s1203_s15 = sshll.u32 %s1865_s17, 4  ;;  %vm790_vm2 = vcmask 261120  }
  0x15   : > { %1257 = vmatpush3.msra.mxu0 %v382_v0  ;;  %1284 = vmatprep.subr.mxu1 %v530_v3  ;;  %v379_v5 = vld [vmem:[%s1853_s3 + $0x20] sm:$0xff]  ;;  %s1597_s19 = scalar_lea.vmem %s1851_s1, %s1158_s9  ;;  %v377_v7 = vld [vmem:[%s1853_s3 + $0x10] sm:$0xff]  ;;  %s1606_s29 = scalar_lea.vmem %s1852_s2, %s1158_s9  ;;  %v376_v12 = vld [vmem:[%s1853_s3 + $0x8] sm:$0xff] }
  0x16   : > { %1258 = vmatprep.subr.mxu0 %v381_v1  ;;  %1285 = vmatpush3.msra.mxu1 %v530_v3  ;;  %v367_v8 = vld [vmem:[%s1597_s19] sm:$0xff]  ;;  %v522_v10 = vld [vmem:[%s1606_s29 + $0x8] sm:$0xff]  ;;  %v523_v11 = vld [vmem:[%s1606_s29 + $0x10] sm:$0xff]  ;;  %s1615_s13 = scalar_lea.vmem %s1850_s0, %s1203_s15  ;;  %s304_s9 = sand.u32 1, %s1470_s25  }
  0x17   : > { %1259 = vmatpush3.msra.mxu0 %v381_v1  ;;  %1286 = vmatprep.subr.mxu1 %v529_v4  ;;  %v521_v9 = vld [vmem:[%s1606_s29] sm:$0xff]  ;;  %v524_v14 = vld [vmem:[%s1606_s29 + $0x18] sm:$0xff]  ;;  %v368_v15 = vld [vmem:[%s1597_s19 + $0x8] sm:$0xff]  ;;  %s1153_s14 = sshll.u32 %s304_s9, 7  ;;  %s1810_s28 = scalar_lea.sflag [#allocation3], %s304_s9 }
  0x18   : > { %1260 = vmatprep.subr.mxu0 %v380_v2  ;;  %1287 = vmatpush3.msra.mxu1 %v529_v4  ;;  %v375_v13 = vld [vmem:[%s1853_s3] sm:$0xff]  ;;  %v1630_v17 = vld [vmem:[%s1615_s13 + $0x70] sm:$0xff]  ;;  %v1633_v18 = vld [vmem:[%s1615_s13 + $0x78] sm:$0xff]  ;;  %s1767_s16 = scalar_lea.vmem [#allocation2], %s1153_s14 }
  0x19   : > { %1261 = vmatpush3.msra.mxu0 %v380_v2  ;;  %1272 = vmatprep.mubr.msk.f32.mxu0 %vm383_vm0, %v367_v8  ;;  %v525_v16 = vld [vmem:[%s1606_s29 + $0x20] sm:$0xff]  ;;  %v364_v19 = vadd.f32 %v1633_v18, %v1630_v17  ;;  %v1638_v20 = vld [vmem:[%s1615_s13 + $0x50] sm:$0xff]  ;;  %v1641_v21 = vld [vmem:[%s1615_s13 + $0x58] sm:$0xff]  ;;  %s1063_s15 = sshll.u32 %s1767_s16, 4  ;;  %s1802_s15 = int_to_ptr.vmem [resolvable:$true] %s1063_s15 }
  0x1a   : > { %1262 = vmatprep.subr.mxu0 %v379_v5  ;;  %1288 = vmatprep.mubr.msk.f32.mxu1 %vm531_vm1, %v521_v9  ;;  %v1644_v22 = vld [vmem:[%s1615_s13 + $0x60] sm:$0xff]  ;;  %v358_v23 = vadd.f32 %v1641_v21, %v1638_v20  ;;  %v1650_v24 = vld [vmem:[%s1615_s13 + $0x68] sm:$0xff]  ;;  %v369_v27 = vld [vmem:[%s1597_s19 + $0x10] sm:$0xff]  ;;  %s1418_s22 = scalar_lea.vmem %s1802_s15, 2048 }
  0x1b   : > { %1263 = vmatpush3.msra.mxu0 %v379_v5  ;;  %1289 = vmatmul.mubr.msk.f32.vlgmr.msra.gmra.mxu1 %vm531_vm1, %v522_v10  ;;  %v1653_v25 = vld [vmem:[%s1615_s13 + $0x40] sm:$0xff]  ;;  %v1656_v26 = vld [vmem:[%s1615_s13 + $0x48] sm:$0xff]  ;;  %v527_v29 = vld [vmem:[%s1606_s29 + $0x30] sm:$0xff]  ;;  %v361_v30 = vadd.f32 %v1650_v24, %v1644_v22  ;;  %p1419_p11 = scmp.ne.s32.totalorder %s1802_s15, %s1418_s22 }
  0x1c   : > { %1264 = vmatprep.subr.mxu0 %v378_v6  ;;  %1291 = vmatprep.mubr.msk.f32.mxu1 %vm531_vm1, %v523_v11  ;;  %v526_v28 = vld [vmem:[%s1606_s29 + $0x28] sm:$0xff]  ;;  %v355_v31 = vadd.f32 %v1656_v26, %v1653_v25  ;;  %v1668_v32 = vld [vmem:[%s1615_s13 + $0x30] sm:$0xff]  ;;  %v1671_v33 = vld [vmem:[%s1615_s13 + $0x38] sm:$0xff] }
  0x1d   : > { %1265 = vmatpush3.msra.mxu0 %v378_v6  ;;  %365 = vadd.xlane.f32.xlu0 %v364_v19  ;;  %v370_v34 = vld [vmem:[%s1597_s19 + $0x18] sm:$0xff]  ;;  %v1677_v35 = vld [vmem:[%s1615_s13 + $0x20] sm:$0xff]  ;;  %v1680_v36 = vld [vmem:[%s1615_s13 + $0x28] sm:$0xff]  ;;  %v352_v39 = vadd.f32 %v1671_v33, %v1668_v32  ;;  %p1420_p12 = pnand %p1419_p11, %p1562_p5 }
  0x1e   : > { %1266 = vmatprep.subr.mxu0 %v377_v7  ;;  %359 = vadd.xlane.f32.xlu1 %v358_v23  ;;  %v371_v37 = vld [vmem:[%s1597_s19 + $0x20] sm:$0xff]  ;;  %v528_v38 = vld [vmem:[%s1606_s29 + $0x38] sm:$0xff]  ;;  %v349_v40 = vadd.f32 %v1680_v36, %v1677_v35  ;;  %v1691_v41 = vld [vmem:[%s1615_s13 + $0x10] sm:$0xff]  ;;  %s1422_s29 = sshll.u32 %s1481_s23, 4  ;;  %s1423_s29 = int_to_ptr.vmem [resolvable:$false] %s1422_s29 }
  0x1f   : > { %1267 = vmatpush3.msra.mxu0 %v377_v7  ;;  %1292 = vmatmul.mubr.msk.f32.gmra.mxu1 %vm531_vm1, %v524_v14  ;;  %v1694_v42 = vld [vmem:[%s1615_s13 + $0x18] sm:$0xff]  ;;  %v372_v43 = vld [vmem:[%s1597_s19 + $0x28] sm:$0xff]  ;;  %v1700_v44 = vld [vmem:[%s1615_s13] sm:$0xff]  ;;  %p1421_p13 = pneg %p1420_p12  ;;  %s1424_s17 = scalar_lea.vmem %s1423_s29, 4096 }
  0x20   : > { %1268 = vmatprep.subr.mxu0 %v376_v12  ;;  %1294 = vmatprep.mubr.msk.f32.mxu1 %vm531_vm1, %v525_v16  ;;  %v1703_v45 = vld [vmem:[%s1615_s13 + $0x8] sm:$0xff]  ;;  %v373_v46 = vld [vmem:[%s1597_s19 + $0x30] sm:$0xff]  ;;  %v346_v47 = vadd.f32 %v1694_v42, %v1691_v41  ;;  %v374_v49 = vld [vmem:[%s1597_s19 + $0x38] sm:$0xff]  ;;  %p1425_p0 = scmp.lt.s32.totalorder %s1802_s15, %s1423_s29  ;;  %p1426_p1 = scmp.lt.s32.totalorder %s1424_s17, %s1418_s22 }
  0x21   : > { %1269 = vmatpush3.msra.mxu0 %v376_v12  ;;  %362 = vadd.xlane.f32.xlu0 %v361_v30  ;;  %v343_v48 = vadd.f32 %v1703_v45, %v1700_v44  ;;  %v677_v50 = vld [vmem:[%s1855_s5] sm:$0xff] }
  0x22   : > { %1270 = vmatprep.subr.mxu0 %v375_v13  ;;  %356 = vadd.xlane.f32.xlu1 %v355_v31  ;;  %p1427_p2 = por %p1426_p1, %p1425_p0 }
  0x23   : > { %1271 = vmatpush3.msra.mxu0 %v375_v13  ;;  %1295 = vmatmul.mubr.msk.f32.gmra.mxu1 %vm531_vm1, %v526_v28 }
  0x24   : > { %1273 = vmatmul.mubr.msk.f32.vlgmr.msra.gmra.mxu0 %vm383_vm0, %v368_v15  ;;  %1297 = vmatprep.mubr.msk.f32.mxu1 %vm531_vm1, %v527_v29  ;;  %p1428_p3 = pnand %p1427_p2, %p1421_p13 }
  0x25   : > { %1275 = vmatprep.mubr.msk.f32.mxu0 %vm383_vm0, %v369_v27  ;;  %353 = vadd.xlane.f32.xlu0 %v352_v39 }
  0x26   : > { %350 = vadd.xlane.f32.xlu1 %v349_v40 }
  0x27   : > { %1298 = vmatmul.mubr.msk.f32.gmra.mxu1 %vm531_vm1, %v528_v38 }
  0x28   : > { %1276 = vmatmul.mubr.msk.f32.gmra.mxu0 %vm383_vm0, %v370_v34 }
  0x29   : > { %1278 = vmatprep.mubr.msk.f32.mxu0 %vm383_vm0, %v371_v37  ;;  %347 = vadd.xlane.f32.xlu0 %v346_v47 }
  0x2a   : > { %344 = vadd.xlane.f32.xlu1 %v343_v48 }
  0x2c   : > { %1279 = vmatmul.mubr.msk.f32.gmra.mxu0 %vm383_vm0, %v372_v43 }
  0x2d   : > { %1281 = vmatprep.mubr.msk.f32.mxu0 %vm383_vm0, %v373_v46 }
  0x30   : > { %1282 = vmatmul.mubr.msk.f32.gmra.mxu0 %vm383_vm0, %v374_v49 }
  0x31   : > { %1316 = vmatprep.mubr.msk.f32.mxu0 %vm383_vm0, %v677_v50 }
  0xa6   : > { %v366_v54 = vpop.xlane.xlu0 %365 }
  0xa7   : > { %v360_v57 = vpop.xlane.xlu1 %359 }
  0xaa   : > { %v363_v61 = vpop.xlane.xlu0 %362 }
  0xab   : > { %v357_v63 = vpop.xlane.xlu1 %356 }
  0xae   : > { %v354_v3 = vpop.xlane.xlu0 %353 }
  0xaf   : > { %v351_v8 = vpop.xlane.xlu1 %350 }
  0xb2   : > { %v348_v23 = vpop.xlane.xlu0 %347 }
  0xb3   : > { %v345_v30 = vpop.xlane.xlu1 %344 }
  0xdb   : > { %v1290_v51 = vpop.f32.mrf.mxu1 }
  0xdd   : > { %v622_v52 = vpop.f32.mrf.mxu1 }
  0xdf   : > { %v1293_v53 = vpop.f32.mrf.mxu1 }
  0xe1   : > { %v632_v56 = vpop.f32.mrf.mxu1 }
  0xe3   : > { %v1296_v60 = vpop.f32.mrf.mxu1 }
  0xe4   : > { %v1274_v55 = vpop.f32.mrf.mxu0 }
  0xe5   : > { %v642_v1 = vpop.f32.mrf.mxu1  ;;  %v514_v31 = vadd.f32 %v1274_v55, %v348_v23 }
  0xe6   : > { %v474_v58 = vpop.f32.mrf.mxu0 }
  0xe7   : > { %v1299_v5 = vpop.f32.mrf.mxu1  ;;  %v513_v38 = vadd.f32 %v474_v58, %v345_v30  ;;  %v662_v43 = vadd.f32 %v1290_v51, %v514_v31  ;;  %v679_v51 = vld [vmem:[%s1855_s5 + $0x10] sm:$0xff] }
  0xe8   : > { %v1277_v59 = vpop.f32.mrf.mxu0 }
  0xe9   : > { %v652_v13 = vpop.f32.mrf.mxu1  ;;  %v516_v14 = vadd.f32 %v1277_v59, %v354_v3  ;;  %v661_v47 = vadd.f32 %v622_v52, %v513_v38  ;;  %v670_v49 = vmul.f32 0.00390625, %v662_v43  ;;  %v680_v52 = vld [vmem:[%s1855_s5 + $0x18] sm:$0xff]  ;;  %v787_v3 = vld [vmem:[%s1856_s6 + $0x28] sm:$0xff] }
  0xea   : > { %v484_v62 = vpop.f32.mrf.mxu0 }
  0xeb   : > { %v515_v27 = vadd.f32 %v484_v62, %v351_v8  ;;  %v664_v34 = vadd.f32 %v1293_v53, %v516_v14  ;;  %v669_v50 = vmul.f32 0.00390625, %v661_v47  ;;  %v678_v53 = vld [vmem:[%s1855_s5 + $0x8] sm:$0xff] }
  0xec   : > { %v1280_v0 = vpop.f32.mrf.mxu0 }
  0xed   : > { %v518_v6 = vadd.f32 %v1280_v0, %v360_v57  ;;  %v663_v39 = vadd.f32 %v632_v56, %v515_v27  ;;  %v672_v46 = vmul.f32 0.00390625, %v664_v34  ;;  %v784_v0 = vld [vmem:[%s1856_s6 + $0x10] sm:$0xff] }
  0xee   : > { %v494_v2 = vpop.f32.mrf.mxu0 }
  0xef   : > { %v517_v10 = vadd.f32 %v494_v2, %v357_v63  ;;  %v666_v15 = vadd.f32 %v1296_v60, %v518_v6  ;;  %v671_v48 = vmul.f32 0.00390625, %v663_v39  ;;  %v783_v63 = vld [vmem:[%s1856_s6 + $0x8] sm:$0xff]  ;;  %v786_v2 = vld [vmem:[%s1856_s6 + $0x20] sm:$0xff]  ;;  %v1480_v6 = vmov 0  }
  0xf0   : > { %v1283_v4 = vpop.f32.mrf.mxu0  ;;  %1385 = vset.pattern.permute.xlu1 %v1480_v6  ;;  %1384 = vset.pattern.permute.xlu0 %v1480_v6 }
  0xf1   : > { %v520_v7 = vadd.f32 %v1283_v4, %v366_v54  ;;  %v665_v28 = vadd.f32 %v642_v1, %v517_v10  ;;  %v674_v37 = vmul.f32 0.00390625, %v666_v15  ;;  %v782_v54 = vld [vmem:[%s1856_s6] sm:$0xff]  ;;  %v785_v1 = vld [vmem:[%s1856_s6 + $0x18] sm:$0xff]  ;;  %v788_v4 = vld [vmem:[%s1856_s6 + $0x30] sm:$0xff] }
  0xf2   : > { %v504_v9 = vpop.f32.mrf.mxu0  ;;  %1330 = vmatprep.mubr.msk.f32.mxu1 %vm790_vm2, %v782_v54 }
  0xf3   : > { %v668_v11 = vadd.f32 %v1299_v5, %v520_v7  ;;  %v519_v12 = vadd.f32 %v504_v9, %v363_v61  ;;  %v673_v40 = vmul.f32 0.00390625, %v665_v28  ;;  %v789_v5 = vld [vmem:[%s1856_s6 + $0x38] sm:$0xff] }
  0xf5   : > { %v676_v16 = vmul.f32 0.00390625, %v668_v11  ;;  %v667_v19 = vadd.f32 %v652_v13, %v519_v12 }
  0xf7   : > { %v675_v29 = vmul.f32 0.00390625, %v667_v19  ;;  %1300 = vmatprep.subr.mxu0 %v676_v16 }
  0xf8   : > { %1301 = vmatpush3.msra.mxu0 %v676_v16 }
  0xf9   : > { %1302 = vmatprep.subr.mxu0 %v675_v29 }
  0xfa   : > { %1303 = vmatpush3.msra.mxu0 %v675_v29 }
  0xfb   : > { %1304 = vmatprep.subr.mxu0 %v674_v37 }
  0xfc   : > { %1305 = vmatpush3.msra.mxu0 %v674_v37 }
  0xfd   : > { %1306 = vmatprep.subr.mxu0 %v673_v40 }
  0xfe   : > { %1307 = vmatpush3.msra.mxu0 %v673_v40 }
  0xff   : > { %1308 = vmatprep.subr.mxu0 %v672_v46 }
 0x100   : > { %1309 = vmatpush3.msra.mxu0 %v672_v46 }
 0x101   : > { %1310 = vmatprep.subr.mxu0 %v671_v48 }
 0x102   : > { %1311 = vmatpush3.msra.mxu0 %v671_v48 }
 0x103   : > { %1312 = vmatprep.subr.mxu0 %v670_v49 }
 0x104   : > { %1313 = vmatpush3.msra.mxu0 %v670_v49 }
 0x105   : > { %1314 = vmatprep.subr.mxu0 %v669_v50 }
 0x106   : > { %1315 = vmatpush3.msra.mxu0 %v669_v50 }
 0x107   : > { %1317 = vmatmul.mubr.msk.f32.vlgmr.msra.gmra.mxu0 %vm383_vm0, %v678_v53 }
 0x108   : > { %1319 = vmatprep.mubr.msk.f32.mxu0 %vm383_vm0, %v679_v51 }
 0x10b   : > { %1320 = vmatmul.mubr.msk.f32.gmra.mxu0 %vm383_vm0, %v680_v52 }
 0x1c7   : > { %v1318_v55 = vpop.f32.mrf.mxu0 }
 0x1c8   : > { %v779_v61 = vmax.f32 %v1318_v55, 0.0 }
 0x1c9   : > { %v759_v56 = vpop.f32.mrf.mxu0 }
 0x1ca   : > { %v778_v62 = vmax.f32 %v759_v56, 0.0 }
 0x1cb   : > { %v1321_v57 = vpop.f32.mrf.mxu0 }
 0x1cc   : > { %v781_v58 = vmax.f32 %v1321_v57, 0.0 }
 0x1cd   : > { %v769_v59 = vpop.f32.mrf.mxu0 }
 0x1ce   : > { %v780_v60 = vmax.f32 %v769_v59, 0.0  ;;  %1322 = vmatprep.subr.mxu1 %v781_v58 }
 0x1cf   : > { %1323 = vmatpush3.msra.mxu1 %v781_v58 }
 0x1d0   : > { %1324 = vmatprep.subr.mxu1 %v780_v60 }
 0x1d1   : > { %1325 = vmatpush3.msra.mxu1 %v780_v60 }
 0x1d2   : > { %1326 = vmatprep.subr.mxu1 %v779_v61 }
 0x1d3   : > { %1327 = vmatpush3.msra.mxu1 %v779_v61 }
 0x1d4   : > { %1328 = vmatprep.subr.mxu1 %v778_v62 }
 0x1d5   : > { %1329 = vmatpush3.msra.mxu1 %v778_v62 }
 0x1d6   : > { %1331 = vmatmul.mubr.msk.f32.vlgmr.msra.gmra.mxu1 %vm790_vm2, %v783_v63 }
 0x1d7   : > { %1333 = vmatprep.mubr.msk.f32.mxu1 %vm790_vm2, %v784_v0 }
 0x1da   : > { %1334 = vmatmul.mubr.msk.f32.gmra.mxu1 %vm790_vm2, %v785_v1 }
 0x1db   : > { %1336 = vmatprep.mubr.msk.f32.mxu1 %vm790_vm2, %v786_v2 }
 0x1de   : > { %1337 = vmatmul.mubr.msk.f32.gmra.mxu1 %vm790_vm2, %v787_v3 }
 0x1df   : > { %1339 = vmatprep.mubr.msk.f32.mxu1 %vm790_vm2, %v788_v4 }
 0x1e2   : > { %1340 = vmatmul.mubr.msk.f32.gmra.mxu1 %vm790_vm2, %v789_v5 }
 0x296   : > { %v1332_v7 = vpop.f32.mrf.mxu1 }
 0x297   : > { %v1190_v8 = vmul.f32 -1.442695, %v1332_v7 }
 0x298   : > { %v881_v9 = vpop.f32.mrf.mxu1 }
 0x299   : > { %1386 = vpow2.f32 %v1190_v8  ;;  %v1189_v10 = vmul.f32 -1.442695, %v881_v9 }
 0x29a   : > { %v1335_v11 = vpop.f32.mrf.mxu1 }
 0x29b   : > { %1388 = vpow2.f32 %v1189_v10  ;;  %v1192_v12 = vmul.f32 -1.442695, %v1335_v11 }
 0x29c   : > { %v891_v13 = vpop.f32.mrf.mxu1 }
 0x29d   : > { %1390 = vpow2.f32 %v1192_v12  ;;  %v1191_v14 = vmul.f32 -1.442695, %v891_v13 }
 0x29e   : > { %v1338_v15 = vpop.f32.mrf.mxu1 }
 0x29f   : > { %1392 = vpow2.f32 %v1191_v14  ;;  %v1194_v16 = vmul.f32 -1.442695, %v1338_v15 }
 0x2a0   : > { %v901_v19 = vpop.f32.mrf.mxu1 }
 0x2a1   : > { %1394 = vpow2.f32 %v1194_v16  ;;  %v1193_v23 = vmul.f32 -1.442695, %v901_v19 }
 0x2a2   : > { %v1341_v27 = vpop.f32.mrf.mxu1 }
 0x2a3   : > { %1396 = vpow2.f32 %v1193_v23  ;;  %v1196_v31 = vmul.f32 -1.442695, %v1341_v27 }
 0x2a4   : > { %v911_v28 = vpop.f32.mrf.mxu1 }
 0x2a5   : > { %v1195_v29 = vmul.f32 -1.442695, %v911_v28 }
 0x2a6   : > { %v1387_v30 = vpop.eup %1386 }
 0x2a7   : > { %v945_v34 = vadd.f32 1.0, %v1387_v30  ;;  %1398 = vpow2.f32 %v1195_v29 }
 0x2a8   : > { %v1389_v37 = vpop.eup %1388 }
 0x2a9   : > { %1400 = vrcp.f32 %v945_v34  ;;  %v944_v38 = vadd.f32 1.0, %v1389_v37 }
 0x2aa   : > { %v1391_v39 = vpop.eup %1390  ;;  %1402 = vpow2.f32 %v1196_v31 }
 0x2ab   : > { %1404 = vrcp.f32 %v944_v38  ;;  %v947_v40 = vadd.f32 1.0, %v1391_v39 }
 0x2ac   : > { %v1393_v43 = vpop.eup %1392 }
 0x2ad   : > { %1406 = vrcp.f32 %v947_v40  ;;  %v946_v46 = vadd.f32 1.0, %v1393_v43 }
 0x2ae   : > { %v1395_v47 = vpop.eup %1394 }
 0x2af   : > { %1408 = vrcp.f32 %v946_v46  ;;  %v949_v48 = vadd.f32 1.0, %v1395_v47 }
 0x2b0   : > { %v1397_v49 = vpop.eup %1396 }
 0x2b1   : > { %1410 = vrcp.f32 %v949_v48  ;;  %v948_v50 = vadd.f32 1.0, %v1397_v49 }
 0x2b3   : > { %1412 = vrcp.f32 %v948_v50 }
 0x2b4   : > { %v1399_v53 = vpop.eup %1398 }
 0x2b5   : > { %v950_v54 = vadd.f32 1.0, %v1399_v53 }
 0x2b6   : > { %v1401_v51 = vpop.eup %1400 }
 0x2b7   : > { %v1403_v52 = vpop.eup %1402  ;;  %v969_v55 = vadd.f32 1.0, %v1401_v51  ;;  %1414 = vrcp.f32 %v950_v54 }
 0x2b8   : > { %v1405_v56 = vpop.eup %1404  ;;  %v951_v59 = vadd.f32 1.0, %v1403_v52 }
 0x2b9   : > { %983 = vperm.xlu1 %1385, %v969_v55   ;;  %v968_v57 = vadd.f32 1.0, %v1405_v56 }
 0x2ba   : > { %v1407_v58 = vpop.eup %1406  ;;  %1416 = vrcp.f32 %v951_v59 }
 0x2bb   : > { %v971_v60 = vadd.f32 1.0, %v1407_v58  ;;  %978 = vperm.xlu0 %1384, %v968_v57  }
 0x2bc   : > { %v1409_v61 = vpop.eup %1408 }
 0x2bd   : > { %993 = vperm.xlu1 %1385, %v971_v60   ;;  %v970_v63 = vadd.f32 1.0, %v1409_v61 }
 0x2be   : > { %v1411_v62 = vpop.eup %1410 }
 0x2bf   : > { %v973_v0 = vadd.f32 1.0, %v1411_v62 }
 0x2c0   : > { %v1413_v1 = vpop.eup %1412 }
 0x2c1   : > { %988 = vperm.xlu1 %1385, %v970_v63   ;;  %v972_v2 = vadd.f32 1.0, %v1413_v1 }
 0x2c4   : > { %v1415_v3 = vpop.eup %1414 }
 0x2c5   : > { %1003 = vperm.xlu1 %1385, %v973_v0   ;;  %v974_v4 = vadd.f32 1.0, %v1415_v3 }
 0x2c7   : > { %v1417_v5 = vpop.eup %1416 }
 0x2c8   : > { %v975_v6 = vadd.f32 1.0, %v1417_v5 }
 0x2c9   : > { %998 = vperm.xlu1 %1385, %v972_v2  }
 0x2cd   : > { %1008 = vperm.xlu1 %1385, %v974_v4  }
 0x2d1   : > { %1013 = vperm.xlu1 %1385, %v975_v6  }
 0x334   : > { %v984_v7 = vpop.permute.xlu1 %983 }
 0x335   : > { %v1018_v8 = vmul.f32 %v984_v7, %v1691_v41  ;;  %v1019_v9 = vmul.f32 %v984_v7, %v1694_v42 }
 0x336   : > { %v979_v10 = vpop.permute.xlu0 %978 }
 0x337   : > { %1034 = vst [vmem:[%s1767_s16 + $0x10] sm:$0xff] %v1018_v8  ;;  %1035 = vst [vmem:[%s1767_s16 + $0x18] sm:$0xff] %v1019_v9  ;;  %v1016_v11 = vmul.f32 %v979_v10, %v1700_v44  ;;  %v1017_v12 = vmul.f32 %v979_v10, %v1703_v45 }
 0x338   : > { %v994_v41 = vpop.permute.xlu1 %993 }
 0x339   : > { %v1022_v42 = vmul.f32 %v994_v41, %v1668_v32  ;;  %v1023_v13 = vmul.f32 %v994_v41, %v1671_v33  ;;  %1032 = vst [vmem:[%s1767_s16] sm:$0xff] %v1016_v11  ;;  %1033 = vst [vmem:[%s1767_s16 + $0x8] sm:$0xff] %v1017_v12 }
 0x33b   : > { %1038 = vst [vmem:[%s1767_s16 + $0x30] sm:$0xff] %v1022_v42  ;;  %1039 = vst [vmem:[%s1767_s16 + $0x38] sm:$0xff] %v1023_v13 }
 0x33c   : > { %v989_v14 = vpop.permute.xlu1 %988 }
 0x33d   : > { %v1020_v15 = vmul.f32 %v989_v14, %v1677_v35  ;;  %v1021_v44 = vmul.f32 %v989_v14, %v1680_v36 }
 0x33f   : > { %1036 = vst [vmem:[%s1767_s16 + $0x20] sm:$0xff] %v1020_v15  ;;  %1037 = vst [vmem:[%s1767_s16 + $0x28] sm:$0xff] %v1021_v44 }
 0x340   : > { %v1004_v45 = vpop.permute.xlu1 %1003 }
 0x341   : > { %v1026_v32 = vmul.f32 %v1004_v45, %v1638_v20  ;;  %v1027_v33 = vmul.f32 %v1004_v45, %v1641_v21 }
 0x343   : > { %1042 = vst [vmem:[%s1767_s16 + $0x50] sm:$0xff] %v1026_v32  ;;  %1043 = vst [vmem:[%s1767_s16 + $0x58] sm:$0xff] %v1027_v33 }
 0x344   : > { %v999_v16 = vpop.permute.xlu1 %998 }
 0x345   : > { %v1024_v19 = vmul.f32 %v999_v16, %v1653_v25  ;;  %v1025_v35 = vmul.f32 %v999_v16, %v1656_v26 }
 0x347   : > { %1040 = vst [vmem:[%s1767_s16 + $0x40] sm:$0xff] %v1024_v19  ;;  %1041 = vst [vmem:[%s1767_s16 + $0x48] sm:$0xff] %v1025_v35 }
 0x348   : > { %v1009_v36 = vpop.permute.xlu1 %1008 }
 0x349   : > { %v1028_v23 = vmul.f32 %v1009_v36, %v1644_v22  ;;  %v1029_v20 = vmul.f32 %v1009_v36, %v1650_v24 }
 0x34b   : > { %1044 = vst [vmem:[%s1767_s16 + $0x60] sm:$0xff] %v1028_v23  ;;  %1045 = vst [vmem:[%s1767_s16 + $0x68] sm:$0xff] %v1029_v20 }
 0x34c   : > { %v1014_v21 = vpop.permute.xlu1 %1013 }
 0x34d   : > { %v1030_v22 = vmul.f32 %v1014_v21, %v1630_v17  ;;  %v1031_v25 = vmul.f32 %v1014_v21, %v1633_v18 }
 0x34f   : > { %1046 = vst [vmem:[%s1767_s16 + $0x70] sm:$0xff] %v1030_v22  ;;  %1047 = vst [vmem:[%s1767_s16 + $0x78] sm:$0xff] %v1031_v25 }
 0x350   : > { %1431 = shalt.err (!%p1428_p3)
}
 0x351   : > { %s1432_s8 = scalar_lea.hbm %s1800_s21, 2048  ;;  %s1436_s14 = scalar_lea.hbm %s1857_s7, 4096 }
 0x352   : > { %p1433_p4 = scmp.ne.s32.totalorder %s1800_s21, %s1432_s8  ;;  %p1437_p9 = scmp.lt.s32.totalorder %s1800_s21, %s1857_s7 }
 0x353   : > { %p1438_p10 = scmp.lt.s32.totalorder %s1436_s14, %s1432_s8 }
 0x354   : > { %p1434_p7 = pnand %p1433_p4, %p1562_p5 }
 0x355   : > { %p1439_p11 = por %p1438_p10, %p1437_p9 }
 0x356   : > { %p1435_p8 = pneg %p1434_p7 }
 0x358   : > { %p1440_p12 = pnand %p1439_p11, %p1435_p8 }
 0x35a   : > { %1443 = shalt.err (!%p1440_p12)
}
 0x35b   : > { %s1482_s20 = smov 256   ;;  %s1483_s19 = smov 16  }
 0x35c   : > { %1342 = dma.vmem_to_hbm [thread:$0]  (%p1562_p5), %s1802_s15, 2048, %s1800_s21, %s1810_s28, %s1482_s20, %s1482_s20, %s1483_s19  }
 0x35d PF: > { %p1348_p13 = scmp.ge.s32.totalorder %s1478_s27, 2  ;;  %s1078_s22 = sand.u32 1, %s1466_s24  }
 0x35e   : > { %s1079_s23 = scalar_lea.sflag [#allocation3], %s1078_s22 }
 0x35f   : > { %p1345_p0 = pnand %p1348_p13, %p1566_p6 }
 0x361   : > { %p1346_p1 = pneg %p1345_p0 }
 0x363   : > { %1461 = dma.done.wait (%p1346_p1), %s1079_s23, 2048  }
 0x364   : > { %1463 = vsyncadd (%p1346_p1), %s1079_s23, 4294965248  ;;  %p17_p2 = scmp.ge.s32.totalorder %s1549_s30, 4   ;;  %s1860_s24 = smov %s1470_s25 }
 0x365   : > { %s1861_s25 = smov %s1474_s26  ;;  %s1862_s26 = smov %s1560_s10 }
 0x366   : > { %s1863_s27 = smov %s1549_s30  ;;  %19 = sbr.rel (!%p17_p2) target bundleno = 3 (0x3), region = 89 }
 0x36b   :  { %1084 = vsyncpa [#allocation3], 1 }
 0x36c   :  { %1086 = vsyncpa [#allocation3 + $0x1], 1 }

</bundles_post_ra>
